<compile_context>
chip_gen: v7x
topology: tpu7x:2x2x1
jax: 0.10.0
libtpu: 0.0.40
codegen_flags: <defaults>
</compile_context>

<pallas_src>
import functools

import jax
import jax.numpy as jnp
import numpy as np
from jax import lax
from jax.experimental import pallas as pl
from jax.experimental.pallas import tpu as pltpu


def _round_up(x, m):
    return ((x + m - 1) // m) * m


def _tpu_generation():
    """Best-effort TPU generation tag ('v5e', 'v6', 'v7', ...) or None."""
    try:
        kind = jax.devices()[0].device_kind.lower().replace(" ", "")
    except Exception:
        return None
    if "v5lite" in kind or "v5e" in kind:
        return "v5e"
    if "v6" in kind:
        return "v6"
    if "7" in kind:
        return "v7"
    if "v5" in kind:
        return "v5p"
    return None


def _pick_time_chunk(T, gen):
    # v5e (4x128^2 MXU, 197 TF/s): tc=256 is MXU-bound -> use 128.
    # v6e/v7x (256x256 MXU): tc=256.  Never exceed the 128-rounded series length.
    tc_pref = 128 if gen == "v5e" else 256
    return max(128, min(tc_pref, _round_up(T, 128)))


def _pick_batch_tile(bpad, tc, slen, vmem_budget=24 * 1024 * 1024):
    """Largest sublane batch tile that divides bpad, fits the VMEM budget and
    leaves >= 2 batch tiles when bpad >= 256 (so a 2-TC chip, e.g. v7x, splits
    the 'parallel' batch axis across both TensorCores)."""
    cap = 1024
    if bpad >= 256:
        cap = min(cap, bpad // 2)
    cap = min(cap, bpad)

    def fits(bt):
        # x + out (double-buffered) + two resident season tables (2 buffers each)
        # + scan matrix U (2 buffers) + decay row + carry column.
        blocks = 4 * bt * tc * (4 + 4 * slen)
        const = 8 * tc * tc + 8 * tc + 4 * bt
        return blocks + const <= vmem_budget

    bt = max(8, cap - cap % 8)
    while bt > 8 and (bpad % bt or not fits(bt)):
        bt -= 8
    return bt


def _hw_scan_kernel(u_ref, pow_ref, x_ref, a_ref, c_ref, out_ref, carry_ref,
                    *, slen, tc, mode, precision):
    """One (batch-tile, time-chunk) step of the blocked Holt-Winters scan.

    Layout: batch on sublanes, time on lanes.
    u_ref     : VMEM (tc, tc)        U[m, j] = alpha*(1-alpha)^(j-m) for j >= m (upper-tri)
    pow_ref   : VMEM (1, tc)         pow[j] = (1-alpha)^(j+1)
    x_ref     : VMEM (bt, tc)        series chunk
    a_ref     : VMEM (slen, bt, tc)  pre-table  (1/season for mult, -season for add)
    c_ref     : VMEM (slen, bt, tc)  post-table (season); both resident per batch tile
    out_ref   : VMEM (bt, tc)        result columns for this chunk's timesteps
    carry_ref : VMEM (bt, 1)         running `smooth`, carried across time chunks
    """
    ti = pl.program_id(1)

    # First time-chunk of every batch tile: smooth_0 = series[:, 0].
    @pl.when(ti == 0)
    def _():
        carry_ref[...] = x_ref[:, 0:1]

    phase = (ti * tc) % slen            # scalar-unit arithmetic
    a = a_ref[phase]                    # (bt, tc) dynamic first-axis select, VMEM only
    x = x_ref[...]
    if mode == "multiplicative":
        b = x * a                       # multiply by precomputed reciprocal (no divide)
    else:
        b = x + a                       # a = -season

    # scan[:, j] = sum_{m<=j} alpha*(1-alpha)^(j-m) * b[:, m]  — one MXU matmul.
    scan = jnp.dot(b, u_ref[...],
                   preferred_element_type=jnp.float32,
                   precision=precision)

    smooth = carry_ref[...] * pow_ref[...] + scan       # (bt,1)*(1,tc) + (bt,tc)
    carry_ref[...] = smooth[:, tc - 1:tc]               # carry smooth_{i0+tc}

    c = c_ref[phase]
    if mode == "multiplicative":
        out_ref[...] = smooth * c
    else:
        out_ref[...] = smooth + c


@functools.partial(jax.jit, static_argnames=("n_preds", "mode", "time_chunk"))
def holts_winters_no_trend(series, series_shifts, alpha, gamma, init_season,
                           n_preds=14, mode="multiplicative", time_chunk=None):
    """series: (B, T) f32; series_shifts: (B,) int.  Returns (B, n_preds) f32
    (only T+1 columns exist when n_preds > T+1 — matches torch's [:, -n_preds:])."""
    if mode not in ("multiplicative", "additive"):
        raise ValueError(f"Invalid mode: {mode}")
    del gamma  # gamma-updated seasonals are never read when return_coefficients=False
    B, T = series.shape
    slen = int(init_season.shape[0])

    series = jnp.asarray(series, jnp.float32)
    alpha = jnp.asarray(alpha, jnp.float32)
    shifts = jnp.asarray(series_shifts, jnp.int32)
    init_season = jnp.asarray(init_season, jnp.float32)

    gen = _tpu_generation()
    tc = _round_up(int(time_chunk), 128) if time_chunk else _pick_time_chunk(T, gen)
    tpad = _round_up(T, tc)
    bpad = _round_up(B, 8)                 # batch on sublanes -> 8-padding only
    bt = _pick_batch_tile(bpad, tc, slen)
    # v5e: HIGHEST (bf16x6) makes the MXU the critical unit; HIGH (bf16x3) keeps
    # the kernel memory-bound and stays within tolerance.
    precision = lax.Precision.HIGH if gen == "v5e" else lax.Precision.HIGHEST

    # torch.roll(v, r)[k] == v[(k - r) % slen]  -> per-batch rolled seasonals.
    k_idx = jnp.arange(slen, dtype=jnp.int32)
    rolled = init_season[jnp.mod(k_idx[None, :] - shifts[:, None], slen)]    # (B, slen)
    rolled = jnp.pad(rolled, ((0, bpad - B), (0, 0)), constant_values=1.0)   # finite padding

    # Phase-indexed seasonal tables (slen, bpad, tc):
    #   tab[p, b, j] = rolled[b, (p + j) % slen]  with  p = (chunk_start % slen).
    p_idx = jnp.arange(slen, dtype=jnp.int32)
    j_idx = jnp.arange(tc, dtype=jnp.int32)
    gidx = jnp.mod(p_idx[:, None] + j_idx[None, :], slen)                    # (slen, tc)
    sea_tab = jnp.transpose(rolled[:, gidx], (1, 0, 2))                      # (slen, bpad, tc)
    a_tab = (1.0 / sea_tab) if mode == "multiplicative" else (-sea_tab)
    c_tab = sea_tab

    # Series kept in its natural (B, T) layout; zero padding is safe because the
    # seasonal tables are finite (1.0 for padded rows) and padded values only
    # flow into padded outputs.
    x_pad = jnp.pad(series, ((0, bpad - B), (0, tpad - T)))

    # Constant scan matrix U and carry-decay powers, built once in the wrapper.
    decay = 1.0 - alpha
    j = jnp.arange(tc, dtype=jnp.int32)
    diff = j[None, :] - j[:, None]                       # diff[m, j] = j - m
    u_mat = jnp.where(diff >= 0,
                      alpha * decay ** jnp.maximum(diff, 0).astype(jnp.float32),
                      0.0).astype(jnp.float32)           # (tc, tc) upper-triangular
    pow_row = (decay ** (j.astype(jnp.float32) + 1.0)).reshape(1, tc).astype(jnp.float32)

    grid = (bpad // bt, tpad // tc)
    kernel = functools.partial(_hw_scan_kernel, slen=slen, tc=tc, mode=mode,
                               precision=precision)

    out = pl.pallas_call(
        kernel,
        out_shape=jax.ShapeDtypeStruct((bpad, tpad), jnp.float32),
        grid_spec=pltpu.PrefetchScalarGridSpec(
            num_scalar_prefetch=0,
            grid=grid,
            in_specs=[
                pl.BlockSpec((tc, tc), lambda bi, ti: (0, 0)),            # U (constant)
                pl.BlockSpec((1, tc), lambda bi, ti: (0, 0)),             # decay powers
                pl.BlockSpec((bt, tc), lambda bi, ti: (bi, ti)),          # series chunk
                pl.BlockSpec((slen, bt, tc), lambda bi, ti: (0, bi, 0)),  # pre-table (resident)
                pl.BlockSpec((slen, bt, tc), lambda bi, ti: (0, bi, 0)),  # post-table (resident)
            ],
            out_specs=pl.BlockSpec((bt, tc), lambda bi, ti: (bi, ti)),
            scratch_shapes=[pltpu.VMEM((bt, 1), jnp.float32)],            # smooth carry
        ),
        compiler_params=pltpu.CompilerParams(
            # batch tiles independent -> megacore; time chunks carry state and
            # must stay the innermost ("arbitrary") axis.
            dimension_semantics=("parallel", "arbitrary"),
            # _pick_batch_tile budgets <= 24 MiB -> safe on v5e/v6e and v7x (64 MiB VMEM).
            vmem_limit_bytes=32 * 1024 * 1024,
        ),
    )(u_mat, pow_row, x_pad, a_tab, c_tab)

    # result[0] = series[:, 0]; result[i+1] = kernel column i  ->  (B, T+1)
    full = jnp.concatenate([series[:, :1], out[:B, :T]], axis=1)
    return full[:, -n_preds:]


def _reference_numpy(series, shifts, alpha, gamma, init_season, n_preds, slen, mode):
    """Literal numpy translation of the PyTorch forward (return_coefficients=False)."""
    series = np.asarray(series, np.float32)
    B, T = series.shape
    seasonals = np.stack(
        [np.roll(np.asarray(init_season, np.float32), int(r)) for r in shifts]
    ).astype(np.float32)                                     # (B, slen)
    seasonals = [seasonals[:, k] for k in range(slen)]
    result = []
    smooth = None
    for i in range(T + n_preds):
        if i == 0:
            smooth = series[:, 0]
            result.append(smooth)
            # no `continue` when return_coefficients=False -> fall through
        if i < T:
            smooth_prev = smooth
            season_prev = seasonals[i % slen]
            if mode == "multiplicative":
                smooth = alpha * (series[:, i] / season_prev) + (1 - alpha) * smooth_prev
                seasonals.append(gamma * (series[:, i] / smooth) + (1 - gamma) * season_prev)
                result.append(smooth * seasonals[i % slen])
            else:
                smooth = alpha * (series[:, i] - season_prev) + (1 - alpha) * smooth_prev
                seasonals.append(gamma * (series[:, i] - smooth) + (1 - gamma) * season_prev)
                result.append(smooth + seasonals[i % slen])
    return np.stack(result, axis=1)[:, -n_preds:]


if __name__ == "__main__":
    INIT_A, INIT_G = 0.1, 0.1
    configs = [
        # (B, T, slen, n_preds, mode)
        (4, 16, 5, 14, "multiplicative"),
        (4, 16, 5, 14, "additive"),
        (5, 300, 7, 20, "multiplicative"),   # >1 time chunk -> carry + nonzero phase
        (12, 300, 5, 10, "additive"),        # batch > 8 sublanes, additive carry path
    ]

    key = jax.random.PRNGKey(0)
    for (B, T, SLEN, N_PREDS, MODE) in configs:
        key, k1, k2, k3 = jax.random.split(key, 4)
        # Deterministic "parameters" (module __init__: init_season in (0, 1)).
        init_season = 0.2 + 0.8 * jax.random.uniform(k1, (SLEN,), dtype=jnp.float32)
        # Positive series so multiplicative mode is well conditioned.
        series = 0.5 + jax.random.uniform(k2, (B, T), dtype=jnp.float32)
        series_shifts = jax.random.randint(k3, (B,), 0, SLEN, dtype=jnp.int32)

        out = holts_winters_no_trend(series, series_shifts, INIT_A, INIT_G,
                                     init_season, n_preds=N_PREDS, mode=MODE)
        out = jax.block_until_ready(out)

        ref = _reference_numpy(np.asarray(series), np.asarray(series_shifts),
                               INIT_A, INIT_G, np.asarray(init_season),
                               N_PREDS, SLEN, MODE)
        assert out.shape == ref.shape, (out.shape, ref.shape)
        np.testing.assert_allclose(np.asarray(out), ref, rtol=2e-3, atol=2e-3)

    print("KERNEL_OK")
</pallas_src>

<mosaic_0001>
module attributes {stable_mosaic.version = 11 : i64} {
  func.func @_hw_scan_kernel(%arg0: i32, %arg1: i32, %arg2: memref<128x128xf32, #tpu.memory_space<vmem>>, %arg3: memref<1x128xf32, #tpu.memory_space<vmem>>, %arg4: memref<8x128xf32, #tpu.memory_space<vmem>>, %arg5: memref<5x8x128xf32, #tpu.memory_space<vmem>>, %arg6: memref<5x8x128xf32, #tpu.memory_space<vmem>>, %arg7: memref<8x128xf32, #tpu.memory_space<vmem>>, %arg8: memref<8x1xf32, #tpu.memory_space<vmem>>) attributes {dimension_semantics = [#tpu.dimension_semantics<parallel>, #tpu.dimension_semantics<arbitrary>], iteration_bounds = array<i64: 1, 1>, scalar_prefetch = 0 : i64, scratch_operands = 1 : i64, tpu.core_type = #tpu.core_type<tc>, window_params = [{pipeline_mode = #tpu.pipeline_mode<synchronous>, transform_indices = @transform_0, window_bounds = array<i64: 128, 128>}, {pipeline_mode = #tpu.pipeline_mode<synchronous>, transform_indices = @transform_1, window_bounds = array<i64: 1, 128>}, {transform_indices = @transform_2, window_bounds = array<i64: 8, 128>}, {transform_indices = @transform_3, window_bounds = array<i64: 5, 8, 128>}, {transform_indices = @transform_4, window_bounds = array<i64: 5, 8, 128>}, {transform_indices = @transform_5, window_bounds = array<i64: 8, 128>}]} {
    %c0_i32 = arith.constant 0 : i32
    %0 = arith.cmpi eq, %arg1, %c0_i32 : i32
    %1 = arith.extui %0 : i1 to i32
    %c0_i32_0 = arith.constant 0 : i32
    %2 = arith.cmpi ne, %1, %c0_i32_0 : i32
    scf.if %2 {
      %c0_20 = arith.constant 0 : index
      %c0_21 = arith.constant 0 : index
      %34 = vector.load %arg4[%c0_20, %c0_21] : memref<8x128xf32, #tpu.memory_space<vmem>>, vector<8x1xf32>
      %c0_22 = arith.constant 0 : index
      %c0_23 = arith.constant 0 : index
      %35 = vector.load %arg8[%c0_22, %c0_23] : memref<8x1xf32, #tpu.memory_space<vmem>>, vector<8x1xf32>
      tpu.vector_store %arg8[%c0_22, %c0_23], %34 {strides = array<i32>} : memref<8x1xf32, #tpu.memory_space<vmem>>, vector<8x1xf32>,
    } else {
    }
    %c128_i32 = arith.constant 128 : i32
    %3 = arith.muli %arg1, %c128_i32 : i32
    %c5_i32 = arith.constant 5 : i32
    %c0_i32_1 = arith.constant 0 : i32
    %4 = arith.cmpi eq, %c5_i32, %c0_i32_1 : i32
    %c1_i32 = arith.constant 1 : i32
    %5 = arith.select %4, %c1_i32, %c5_i32 : i32
    %6 = arith.remsi %3, %5 : i32
    %c0_i32_2 = arith.constant 0 : i32
    %7 = arith.cmpi ne, %6, %c0_i32_2 : i32
    %c0_i32_3 = arith.constant 0 : i32
    %8 = arith.cmpi slt, %6, %c0_i32_3 : i32
    %c0_i32_4 = arith.constant 0 : i32
    %9 = arith.cmpi slt, %5, %c0_i32_4 : i32
    %10 = arith.xori %8, %9 : i1
    %11 = arith.andi %10, %7 : i1
    %12 = arith.addi %6, %5 : i32
    %13 = arith.select %11, %12, %6 : i32
    %14 = arith.index_cast %13 : i32 to index
    %c0 = arith.constant 0 : index
    %c0_5 = arith.constant 0 : index
    %15 = vector.load %arg5[%14, %c0, %c0_5] : memref<5x8x128xf32, #tpu.memory_space<vmem>>, vector<1x8x128xf32>
    %16 = vector.shape_cast %15 : vector<1x8x128xf32> to vector<8x128xf32>
    %c0_6 = arith.constant 0 : index
    %c0_7 = arith.constant 0 : index
    %17 = vector.load %arg4[%c0_6, %c0_7] : memref<8x128xf32, #tpu.memory_space<vmem>>, vector<8x128xf32>
    %18 = arith.mulf %17, %16 : vector<8x128xf32>
    %c0_8 = arith.constant 0 : index
    %c0_9 = arith.constant 0 : index
    %19 = vector.load %arg2[%c0_8, %c0_9] : memref<128x128xf32, #tpu.memory_space<vmem>>, vector<128x128xf32>
    %cst = arith.constant dense<0.000000e+00> : vector<8x128xf32>
    %20 = tpu.matmul %18, %19, %cst {dimension_numbers = #tpu.dot_dimension_numbers<[1], [0], [0], [1], [0, 0, 1, 1], [], []>, precision = #tpu.contract_precision<fp32>} : vector<8x128xf32>, vector<128x128xf32>, vector<8x128xf32> -> vector<8x128xf32>
    %c0_10 = arith.constant 0 : index
    %c0_11 = arith.constant 0 : index
    %21 = vector.load %arg8[%c0_10, %c0_11] : memref<8x1xf32, #tpu.memory_space<vmem>>, vector<8x1xf32>
    %c0_12 = arith.constant 0 : index
    %c0_13 = arith.constant 0 : index
    %22 = vector.load %arg3[%c0_12, %c0_13] : memref<1x128xf32, #tpu.memory_space<vmem>>, vector<1x128xf32>
    %23 = vector.broadcast %21 : vector<8x1xf32> to vector<8x128xf32>
    %24 = vector.broadcast %22 : vector<1x128xf32> to vector<8x128xf32>
    %25 = arith.mulf %23, %24 : vector<8x128xf32>
    %26 = arith.addf %25, %20 : vector<8x128xf32>
    %27 = vector.extract_strided_slice %26 {offsets = [0, 127], sizes = [8, 1], strides = [1, 1]} : vector<8x128xf32> to vector<8x1xf32>
    %c0_14 = arith.constant 0 : index
    %c0_15 = arith.constant 0 : index
    %28 = vector.load %arg8[%c0_14, %c0_15] : memref<8x1xf32, #tpu.memory_space<vmem>>, vector<8x1xf32>
    tpu.vector_store %arg8[%c0_14, %c0_15], %27 {strides = array<i32>} : memref<8x1xf32, #tpu.memory_space<vmem>>, vector<8x1xf32>,
    %29 = arith.index_cast %13 : i32 to index
    %c0_16 = arith.constant 0 : index
    %c0_17 = arith.constant 0 : index
    %30 = vector.load %arg6[%29, %c0_16, %c0_17] : memref<5x8x128xf32, #tpu.memory_space<vmem>>, vector<1x8x128xf32>
    %31 = vector.shape_cast %30 : vector<1x8x128xf32> to vector<8x128xf32>
    %32 = arith.mulf %26, %31 : vector<8x128xf32>
    %c0_18 = arith.constant 0 : index
    %c0_19 = arith.constant 0 : index
    %33 = vector.load %arg7[%c0_18, %c0_19] : memref<8x128xf32, #tpu.memory_space<vmem>>, vector<8x128xf32>
    tpu.vector_store %arg7[%c0_18, %c0_19], %32 {strides = array<i32>} : memref<8x128xf32, #tpu.memory_space<vmem>>, vector<8x128xf32>,
    return
  }
  func.func @transform_0(%arg0: i32, %arg1: i32) -> (i32, i32) {
    %c0_i32 = arith.constant 0 : i32
    %c0_i32_0 = arith.constant 0 : i32
    %c0_i32_1 = arith.constant 0 : i32
    return %c0_i32, %c0_i32_0 : i32, i32
  }
  func.func @transform_1(%arg0: i32, %arg1: i32) -> (i32, i32) {
    %c0_i32 = arith.constant 0 : i32
    %c0_i32_0 = arith.constant 0 : i32
    %c0_i32_1 = arith.constant 0 : i32
    return %c0_i32, %c0_i32_0 : i32, i32
  }
  func.func @transform_2(%arg0: i32, %arg1: i32) -> (i32, i32) {
    %c0_i32 = arith.constant 0 : i32
    return %arg0, %arg1 : i32, i32
  }
  func.func @transform_3(%arg0: i32, %arg1: i32) -> (i32, i32, i32) {
    %c0_i32 = arith.constant 0 : i32
    %c0_i32_0 = arith.constant 0 : i32
    %c0_i32_1 = arith.constant 0 : i32
    return %c0_i32, %arg0, %c0_i32_0 : i32, i32, i32
  }
  func.func @transform_4(%arg0: i32, %arg1: i32) -> (i32, i32, i32) {
    %c0_i32 = arith.constant 0 : i32
    %c0_i32_0 = arith.constant 0 : i32
    %c0_i32_1 = arith.constant 0 : i32
    return %c0_i32, %arg0, %c0_i32_0 : i32, i32, i32
  }
  func.func @transform_5(%arg0: i32, %arg1: i32) -> (i32, i32) {
    %c0_i32 = arith.constant 0 : i32
    return %arg0, %arg1 : i32, i32
  }
}

</mosaic_0001>

<bundles_post_ra>
// kernel: holts_winters_no_trend.1
= control target key start
LH: loop header
LB: loop body
LE: loop exit
PB: predicated region body
PF: predicated region fallthrough
CT: control target
= control target key end

     0   :  { %v1199_v0 = vmov 0.0|0.0   ;;  %vm1200_vm0 = vmmov 0   ;;  %v1201_v10 = vmov 0.0   ;;  %vm25_vm1 = vcmask 7168   ;;  %s1203_s30 = smov 1   ;;  %s1570_s0 = inlined_call_operand.vmem [shape: f32[128,128], index: 0, kind: input, shape index: {}]   ;;  %s1571_s2 = inlined_call_operand.vmem [shape: f32[8,128], index: 2, kind: input, shape index: {}]   ;;  %s1572_s3 = inlined_call_operand.vmem [shape: f32[5,8,128], index: 3, kind: input, shape index: {}]   ;;  %s1573_s1 = inlined_call_operand.vmem [shape: f32[1,128], index: 1, kind: input, shape index: {}]   ;;  %s1574_s4 = inlined_call_operand.vmem [shape: f32[5,8,128], index: 4, kind: input, shape index: {}]   ;;  %s1575_s5 = inlined_call_operand.vmem [shape: f32[8,128], index: 5, kind: output, shape index: {}]  }
   0x1   :  { %1049 = vmatprep.subr.bf16.mxu0 %v1199_v0  ;;  %v46_v1 = vld [vmem:[%s1570_s0] sm:$0xff]  ;;  %v47_v2 = vld [vmem:[%s1570_s0 + $0x8] sm:$0xff]  ;;  %v48_v3 = vld [vmem:[%s1570_s0 + $0x10] sm:$0xff]  ;;  %1073 = vmatprep.subr.bf16.mxu1 %v1199_v0  ;;  %v1202_v15 = vmov 0  }
   0x2   :  { %v63_v4 = vand.u32 4294901760, %v46_v1  ;;  %v66_v5 = vand.u32 4294901760, %v47_v2  ;;  %v49_v6 = vld [vmem:[%s1570_s0 + $0x18] sm:$0xff]  ;;  %v69_v7 = vand.u32 4294901760, %v48_v3  ;;  %v50_v8 = vld [vmem:[%s1570_s0 + $0x20] sm:$0xff]  ;;  %v51_v9 = vld [vmem:[%s1570_s0 + $0x28] sm:$0xff]  ;;  %871 = vmatprep.mubr.msk.f32.mxu0 %vm1200_vm0, %v1201_v10  ;;  %906 = vmatprep.mubr.msk.f32.mxu1 %vm1200_vm0, %v1201_v10 }
   0x3   :  { %v72_v11 = vand.u32 4294901760, %v49_v6  ;;  %v75_v12 = vand.u32 4294901760, %v50_v8  ;;  %v78_v13 = vand.u32 4294901760, %v51_v9  ;;  %v52_v14 = vld [vmem:[%s1570_s0 + $0x30] sm:$0xff]  ;;  %1198 = vset.pattern.permute.xlu0 %v1202_v15  ;;  %v53_v20 = vld [vmem:[%s1570_s0 + $0x38] sm:$0xff]  ;;  %v54_v21 = vld [vmem:[%s1570_s0 + $0x40] sm:$0xff] }
   0x4   :  { %v1261_v16 = vpack.c.bf16 %v66_v5, %v63_v4  ;;  %v1263_v17 = vsub.f32 %v46_v1, %v63_v4  ;;  %v1265_v18 = vsub.f32 %v47_v2, %v66_v5  ;;  %v1267_v19 = vsub.f32 %v48_v3, %v69_v7  ;;  %v55_v28 = vld [vmem:[%s1570_s0 + $0x48] sm:$0xff]  ;;  %v1290_v29 = vld [vmem:[%s1571_s2] sm:$0xff]  ;;  %v56_v42 = vld [vmem:[%s1570_s0 + $0x50] sm:$0xff] }
   0x5   :  { %v1275_v22 = vpack.c.bf16 %v72_v11, %v69_v7  ;;  %v1277_v23 = vsub.f32 %v49_v6, %v72_v11  ;;  %v1280_v24 = vsub.f32 %v50_v8, %v75_v12  ;;  %v81_v27 = vand.u32 4294901760, %v52_v14  ;;  %26 = vst.msk [vmem:[#allocation2] sm:$0xff] %vm25_vm1, %v1290_v29  ;;  %v57_v43 = vld [vmem:[%s1570_s0 + $0x58] sm:$0xff]  ;;  %v1333_v52 = vld [vmem:[%s1570_s0 + $0x60] sm:$0xff]  ;;  %v59_v61 = vld [vmem:[%s1570_s0 + $0x68] sm:$0xff] }
   0x6   :  { %1051 = vmatpush3.bf16.msra.mxu0 %v1261_v16  ;;  %v156_v25 = vand.u32 4294901760, %v1263_v17  ;;  %v163_v26 = vand.u32 4294901760, %v1265_v18  ;;  %v84_v30 = vand.u32 4294901760, %v53_v20  ;;  %v170_v31 = vand.u32 4294901760, %v1267_v19  ;;  %v1356_v3 = vld [vmem:[%s1570_s0 + $0x70] sm:$0xff] }
   0x7   :  { %1052 = vmatprep.subr.bf16.mxu0 %v1199_v0  ;;  %v177_v32 = vand.u32 4294901760, %v1277_v23  ;;  %v87_v33 = vand.u32 4294901760, %v54_v21  ;;  %v1297_v34 = vsub.f32 %v51_v9, %v78_v13  ;;  %v1305_v37 = vsub.f32 %v52_v14, %v81_v27  ;;  %v61_v9 = vld [vmem:[%s1570_s0 + $0x78] sm:$0xff] }
   0x8   :  { %v157_v35 = vsub.f32 %v1263_v17, %v156_v25  ;;  %v164_v36 = vsub.f32 %v1265_v18, %v163_v26  ;;  %v1307_v38 = vsub.f32 %v53_v20, %v84_v30  ;;  %v171_v39 = vsub.f32 %v1267_v19, %v170_v31 }
   0x9   :  { %v178_v40 = vsub.f32 %v1277_v23, %v177_v32  ;;  %v90_v41 = vand.u32 4294901760, %v55_v28  ;;  %v1322_v44 = vpack.c.bf16 %v78_v13, %v75_v12  ;;  %v1324_v47 = vpack.c.bf16 %v84_v30, %v81_v27 }
   0xa   :  { %1054 = vmatpush3.bf16.msra.mxu0 %v1275_v22  ;;  %v158_v45 = vand.u32 4294901760, %v157_v35  ;;  %v165_v46 = vand.u32 4294901760, %v164_v36  ;;  %v172_v48 = vand.u32 4294901760, %v171_v39  ;;  %v1327_v50 = vsub.f32 %v54_v21, %v87_v33  ;;  %v43_v36 = vld [vmem:[%s1572_s3] sm:$0xff] }
   0xb   :  { %1055 = vmatprep.subr.bf16.mxu0 %v1199_v0  ;;  %v179_v49 = vand.u32 4294901760, %v178_v40  ;;  %v184_v51 = vand.u32 4294901760, %v1280_v24  ;;  %v191_v54 = vand.u32 4294901760, %v1297_v34  ;;  %v93_v55 = vand.u32 4294901760, %v56_v42 }
   0xc   :  { %v1074_v53 = vpack.c.bf16 %v165_v46, %v158_v45  ;;  %v96_v56 = vand.u32 4294901760, %v57_v43  ;;  %v1336_v57 = vsub.f32 %v55_v28, %v90_v41  ;;  %v198_v59 = vand.u32 4294901760, %v1305_v37  ;;  %v703_v4 = vld [vmem:[#allocation2] sm:$0xff] }
   0xd   :  { %v185_v58 = vsub.f32 %v1280_v24, %v184_v51  ;;  %v205_v60 = vand.u32 4294901760, %v1307_v38  ;;  %v1077_v62 = vpack.c.bf16 %v179_v49, %v172_v48  ;;  %v1347_v63 = vpack.c.bf16 %v90_v41, %v87_v33  ;;  %707 = vperm.xlu0 %1198, %v703_v4  }
   0xe   :  { %1057 = vmatpush3.bf16.msra.mxu0 %v1322_v44  ;;  %1075 = vmatpush3.bf16.msra.mxu1 %v1074_v53  ;;  %v192_v1 = vsub.f32 %v1297_v34, %v191_v54  ;;  %v99_v2 = vand.u32 4294901760, %v1333_v52  ;;  %v1360_v6 = vsub.f32 %v56_v42, %v93_v55  ;;  %v199_v7 = vsub.f32 %v1305_v37, %v198_v59 }
   0xf   :  { %1058 = vmatprep.subr.bf16.mxu0 %v1199_v0  ;;  %1076 = vmatprep.subr.bf16.mxu1 %v1199_v0  ;;  %v186_v5 = vand.u32 4294901760, %v185_v58  ;;  %v206_v8 = vsub.f32 %v1307_v38, %v205_v60  ;;  %v1371_v12 = vsub.f32 %v57_v43, %v96_v56  ;;  %v102_v13 = vand.u32 4294901760, %v59_v61 }
  0x10   :  { %v193_v11 = vand.u32 4294901760, %v192_v1  ;;  %v212_v14 = vand.u32 4294901760, %v1327_v50  ;;  %v200_v15 = vand.u32 4294901760, %v199_v7  ;;  %v219_v21 = vand.u32 4294901760, %v1336_v57 }
  0x11   :  { %v207_v20 = vand.u32 4294901760, %v206_v8  ;;  %v105_v27 = vand.u32 4294901760, %v1356_v3  ;;  %v1378_v30 = vsub.f32 %v1333_v52, %v99_v2  ;;  %v1380_v33 = vsub.f32 %v59_v61, %v102_v13 }
  0x12   :  { %1060 = vmatpush3.bf16.msra.mxu0 %v1324_v47  ;;  %1078 = vmatpush3.bf16.msra.mxu1 %v1077_v62  ;;  %v1080_v28 = vpack.c.bf16 %v193_v11, %v186_v5  ;;  %v108_v35 = vand.u32 4294901760, %v61_v9  ;;  %v213_v39 = vsub.f32 %v1327_v50, %v212_v14  ;;  %v220_v40 = vsub.f32 %v1336_v57, %v219_v21 }
  0x13   :  { %1061 = vmatprep.subr.bf16.mxu0 %v1199_v0  ;;  %1079 = vmatprep.subr.bf16.mxu1 %v1199_v0  ;;  %v226_v41 = vand.u32 4294901760, %v1360_v6  ;;  %v1394_v42 = vpack.c.bf16 %v96_v56, %v93_v55  ;;  %v1083_v43 = vpack.c.bf16 %v207_v20, %v200_v15  ;;  %v1397_v45 = vsub.f32 %v1356_v3, %v105_v27 }
  0x14   :  { %v233_v46 = vand.u32 4294901760, %v1371_v12  ;;  %v214_v48 = vand.u32 4294901760, %v213_v39  ;;  %v221_v49 = vand.u32 4294901760, %v220_v40  ;;  %v45_v53 = vmul.f32 %v43_v36, %v1290_v29 }
  0x15   :  { %v227_v52 = vsub.f32 %v1360_v6, %v226_v41  ;;  %v1405_v58 = vsub.f32 %v61_v9, %v108_v35  ;;  %v240_v56 = vand.u32 4294901760, %v1378_v30  ;;  %v247_v61 = vand.u32 4294901760, %v1380_v33 }
  0x16   :  { %1063 = vmatpush3.bf16.msra.mxu0 %v1347_v63  ;;  %1081 = vmatpush3.bf16.msra.mxu1 %v1080_v28  ;;  %v234_v55 = vsub.f32 %v1371_v12, %v233_v46  ;;  %v1414_v62 = vand.u32 4294901760, %v45_v53  ;;  %v1416_v29 = vpack.c.bf16 %v102_v13, %v99_v2  ;;  %v1086_v1 = vpack.c.bf16 %v221_v49, %v214_v48 }
  0x17   :  { %1064 = vmatprep.subr.bf16.mxu0 %v1199_v0  ;;  %1082 = vmatprep.subr.bf16.mxu1 %v1199_v0  ;;  %v228_v3 = vand.u32 4294901760, %v227_v52  ;;  %v254_v5 = vand.u32 4294901760, %v1397_v45  ;;  %v241_v8 = vsub.f32 %v1378_v30, %v240_v56  ;;  %v248_v2 = vsub.f32 %v1380_v33, %v247_v61 }
  0x18   :  { %v1419_v4 = vsub.f32 %v45_v53, %v1414_v62  ;;  %v235_v7 = vand.u32 4294901760, %v234_v55  ;;  %v261_v9 = vand.u32 4294901760, %v1405_v58  ;;  %v1433_v13 = vpack.c.bf16 %v108_v35, %v105_v27 }
  0x19   :  { %v255_v20 = vsub.f32 %v1397_v45, %v254_v5  ;;  %v242_v36 = vand.u32 4294901760, %v241_v8  ;;  %v249_v39 = vand.u32 4294901760, %v248_v2  ;;  %v1101_v53 = vpack.c.bf16 %v1277_v23, %v1267_v19 }
  0x1a   :  { %1066 = vmatpush3.bf16.msra.mxu0 %v1394_v42  ;;  %1084 = vmatpush3.bf16.msra.mxu1 %v1083_v43  ;;  %v145_v11 = vand.u32 4294901760, %v1419_v4  ;;  %v1089_v28 = vpack.c.bf16 %v235_v7, %v228_v3  ;;  %v262_v40 = vsub.f32 %v1405_v58, %v261_v9  ;;  %v1098_v43 = vpack.c.bf16 %v1265_v18, %v1263_v17 }
  0x1b   :  { %1067 = vmatprep.subr.bf16.mxu0 %v1199_v0  ;;  %1085 = vmatprep.subr.bf16.mxu1 %v1199_v0  ;;  %v1092_v35 = vpack.c.bf16 %v249_v39, %v242_v36  ;;  %v256_v48 = vand.u32 4294901760, %v255_v20  ;;  %v1104_v55 = vpack.c.bf16 %v1297_v34, %v1280_v24  ;;  %v1110_v3 = vpack.c.bf16 %v1336_v57, %v1327_v50 }
  0x1c   :  { %v146_v15 = vsub.f32 %v1419_v4, %v145_v11  ;;  %v263_v49 = vand.u32 4294901760, %v262_v40  ;;  %v1113_v7 = vpack.c.bf16 %v1371_v12, %v1360_v6  ;;  %v1116_v8 = vpack.c.bf16 %v1380_v33, %v1378_v30  ;;  %v725_v12 = vld [vmem:[%s1574_s4] sm:$0xff] }
  0x1d   :  { %v1119_v2 = vpack.c.bf16 %v1405_v58, %v1397_v45  ;;  %v1149_v20 = vpack.c.bf16 %v177_v32, %v170_v31  ;;  %v1152_v17 = vpack.c.bf16 %v191_v54, %v184_v51  ;;  %v1155_v18 = vpack.c.bf16 %v205_v60, %v198_v59 }
  0x1e   :  { %1069 = vmatpush3.bf16.msra.mxu0 %v1416_v29  ;;  %1087 = vmatpush3.bf16.msra.mxu1 %v1086_v1  ;;  %v147_v27 = vand.u32 4294901760, %v146_v15  ;;  %v1095_v52 = vpack.c.bf16 %v263_v49, %v256_v48  ;;  %v1107_v1 = vpack.c.bf16 %v1307_v38, %v1305_v37  ;;  %v1146_v15 = vpack.c.bf16 %v163_v26, %v156_v25 }
  0x1f   :  { %1070 = vmatprep.subr.bf16.mxu0 %v1199_v0  ;;  %1088 = vmatprep.subr.bf16.mxu1 %v1199_v0  ;;  %v1164_v19 = vpack.c.bf16 %v247_v61, %v240_v56 }
  0x22   :  { %1072 = vmatpush3.bf16.msra.mxu0 %v1433_v13  ;;  %1090 = vmatpush3.bf16.msra.mxu1 %v1089_v28 }
  0x23   :  { %1091 = vmatprep.subr.bf16.mxu1 %v1199_v0  ;;  %1097 = vmatprep.subr.bf16.mxu0 %v1199_v0 }
  0x25   :  { %872 = vmatmul.mubr.f32.vlgmr.msra.gmra.mrb[0].mxu0 %v147_v27 }
  0x26   :  { %1093 = vmatpush3.bf16.msra.mxu1 %v1092_v35  ;;  %1099 = vmatpush3.bf16.msra.mxu0 %v1098_v43 }
  0x27   :  { %1094 = vmatprep.subr.bf16.mxu1 %v1199_v0  ;;  %1100 = vmatprep.subr.bf16.mxu0 %v1199_v0 }
  0x28   :  { %941 = vmatprep.mubr.msk.f32.mxu0 %vm1200_vm0, %v1201_v10 }
  0x2a   :  { %1096 = vmatpush3.bf16.msra.mxu1 %v1095_v52  ;;  %1102 = vmatpush3.bf16.msra.mxu0 %v1101_v53 }
  0x2b   :  { %1103 = vmatprep.subr.bf16.mxu0 %v1199_v0  ;;  %1121 = vmatprep.subr.bf16.mxu1 %v1199_v0 }
  0x2d   :  { %907 = vmatmul.mubr.f32.vlgmr.msra.gmra.mrb[0].mxu1 %v1414_v62 }
  0x2e   :  { %1105 = vmatpush3.bf16.msra.mxu0 %v1104_v55  ;;  %1123 = vmatpush3.bf16.msra.mxu1 %v1261_v16 }
  0x2f   :  { %1106 = vmatprep.subr.bf16.mxu0 %v1199_v0  ;;  %1124 = vmatprep.subr.bf16.mxu1 %v1199_v0 }
  0x30   :  { %976 = vmatprep.mubr.msk.f32.mxu1 %vm1200_vm0, %v1201_v10 }
  0x32   :  { %1108 = vmatpush3.bf16.msra.mxu0 %v1107_v1  ;;  %1126 = vmatpush3.bf16.msra.mxu1 %v1275_v22 }
  0x33   :  { %1109 = vmatprep.subr.bf16.mxu0 %v1199_v0  ;;  %1127 = vmatprep.subr.bf16.mxu1 %v1199_v0 }
  0x36   :  { %1111 = vmatpush3.bf16.msra.mxu0 %v1110_v3  ;;  %1129 = vmatpush3.bf16.msra.mxu1 %v1322_v44 }
  0x37   :  { %1112 = vmatprep.subr.bf16.mxu0 %v1199_v0  ;;  %1130 = vmatprep.subr.bf16.mxu1 %v1199_v0 }
  0x3a   :  { %1114 = vmatpush3.bf16.msra.mxu0 %v1113_v7  ;;  %1132 = vmatpush3.bf16.msra.mxu1 %v1324_v47 }
  0x3b   :  { %1115 = vmatprep.subr.bf16.mxu0 %v1199_v0  ;;  %1133 = vmatprep.subr.bf16.mxu1 %v1199_v0 }
  0x3e   :  { %1117 = vmatpush3.bf16.msra.mxu0 %v1116_v8  ;;  %1135 = vmatpush3.bf16.msra.mxu1 %v1347_v63 }
  0x3f   :  { %1118 = vmatprep.subr.bf16.mxu0 %v1199_v0  ;;  %1136 = vmatprep.subr.bf16.mxu1 %v1199_v0 }
  0x42   :  { %1120 = vmatpush3.bf16.msra.mxu0 %v1119_v2  ;;  %1138 = vmatpush3.bf16.msra.mxu1 %v1394_v42 }
  0x43   :  { %1139 = vmatprep.subr.bf16.mxu1 %v1199_v0  ;;  %1145 = vmatprep.subr.bf16.mxu0 %v1199_v0 }
  0x45   :  { %942 = vmatmul.mubr.f32.vlgmr.msra.gmra.mrb[2].mxu0 %v1419_v4 }
  0x46   :  { %1141 = vmatpush3.bf16.msra.mxu1 %v1416_v29  ;;  %1147 = vmatpush3.bf16.msra.mxu0 %v1146_v15 }
  0x47   :  { %1142 = vmatprep.subr.bf16.mxu1 %v1199_v0  ;;  %1148 = vmatprep.subr.bf16.mxu0 %v1199_v0 }
  0x48   :  { %1011 = vmatprep.mubr.msk.f32.mxu0 %vm1200_vm0, %v1201_v10 }
  0x4a   :  { %1144 = vmatpush3.bf16.msra.mxu1 %v1433_v13  ;;  %1150 = vmatpush3.bf16.msra.mxu0 %v1149_v20 }
  0x4b   :  { %1151 = vmatprep.subr.bf16.mxu0 %v1199_v0  ;;  %1169 = vmatprep.subr.bf16.mxu1 %v1199_v0 }
  0x4d   :  { %977 = vmatmul.mubr.f32.vlgmr.msra.gmra.mrb[2].mxu1 %v145_v11 }
  0x4e   :  { %1153 = vmatpush3.bf16.msra.mxu0 %v1152_v17  ;;  %1171 = vmatpush3.bf16.msra.mxu1 %v1261_v16  ;;  %v1158_v16 = vpack.c.bf16 %v219_v21, %v212_v14 }
  0x4f   :  { %1154 = vmatprep.subr.bf16.mxu0 %v1199_v0  ;;  %1172 = vmatprep.subr.bf16.mxu1 %v1199_v0 }
  0x50   :  { %1046 = vmatprep.mubr.msk.f32.mxu1 %vm1200_vm0, %v1201_v10  ;;  %v1161_v10 = vpack.c.bf16 %v233_v46, %v226_v41 }
  0x52   :  { %1156 = vmatpush3.bf16.msra.mxu0 %v1155_v18  ;;  %1174 = vmatpush3.bf16.msra.mxu1 %v1275_v22  ;;  %v1167_v22 = vpack.c.bf16 %v261_v9, %v254_v5 }
  0x53   :  { %1157 = vmatprep.subr.bf16.mxu0 %v1199_v0  ;;  %1175 = vmatprep.subr.bf16.mxu1 %v1199_v0 }
  0x56   :  { %1159 = vmatpush3.bf16.msra.mxu0 %v1158_v16  ;;  %1177 = vmatpush3.bf16.msra.mxu1 %v1322_v44 }
  0x57   :  { %1160 = vmatprep.subr.bf16.mxu0 %v1199_v0  ;;  %1178 = vmatprep.subr.bf16.mxu1 %v1199_v0 }
  0x5a   :  { %1162 = vmatpush3.bf16.msra.mxu0 %v1161_v10  ;;  %1180 = vmatpush3.bf16.msra.mxu1 %v1324_v47 }
  0x5b   :  { %1163 = vmatprep.subr.bf16.mxu0 %v1199_v0  ;;  %1181 = vmatprep.subr.bf16.mxu1 %v1199_v0 }
  0x5e   :  { %1165 = vmatpush3.bf16.msra.mxu0 %v1164_v19  ;;  %1183 = vmatpush3.bf16.msra.mxu1 %v1347_v63 }
  0x5f   :  { %1166 = vmatprep.subr.bf16.mxu0 %v1199_v0  ;;  %1184 = vmatprep.subr.bf16.mxu1 %v1199_v0 }
  0x62   :  { %1168 = vmatpush3.bf16.msra.mxu0 %v1167_v22  ;;  %1186 = vmatpush3.bf16.msra.mxu1 %v1394_v42 }
  0x63   :  { %1187 = vmatprep.subr.bf16.mxu1 %v1199_v0 }
  0x65   :  { %1012 = vmatmul.mubr.f32.vlgmr.msra.gmra.mrb[4].mxu0 %v1414_v62 }
  0x66   :  { %1189 = vmatpush3.bf16.msra.mxu1 %v1416_v29 }
  0x67   :  { %1190 = vmatprep.subr.bf16.mxu1 %v1199_v0  ;;  %v736_v0 = vld [vmem:[%s1573_s1] ss:$0 sm:$0xff] }
  0x6a   :  { %1192 = vmatpush3.bf16.msra.mxu1 %v1433_v13 }
  0x6d   :  { %1047 = vmatmul.mubr.f32.vlgmr.msra.gmra.mrb[4].mxu1 %v1414_v62 }
  0x8c   :  { %v708_v57 = vpop.permute.xlu0 %707 }
  0x8d   :  { %v716_v59 = vmul.f32 %v736_v0, %v708_v57 }
  0xf8   :  { %v149_v23 = vpop.f32.mrb[0].mxu0 }
  0xf9   :  { %v873_v24 = vpop.f32.mrb[1].mxu0 }
 0x100   :  { %v300_v25 = vpop.f32.mrb[0].mxu1 }
 0x101   :  { %v301_v26 = vadd.f32 %v300_v25, %v149_v23  ;;  %v908_v31 = vpop.f32.mrb[1].mxu1 }
 0x118   :  { %v404_v32 = vpop.f32.mrb[2].mxu0 }
 0x119   :  { %v405_v34 = vadd.f32 %v404_v32, %v301_v26  ;;  %v943_v37 = vpop.f32.mrb[3].mxu0 }
 0x120   :  { %v493_v38 = vpop.f32.mrb[2].mxu1 }
 0x121   :  { %v494_v44 = vadd.f32 %v493_v38, %v405_v34  ;;  %v978_v47 = vpop.f32.mrb[3].mxu1 }
 0x138   :  { %v612_v50 = vpop.f32.mrb[4].mxu0 }
 0x139   :  { %v613_v51 = vadd.f32 %v612_v50, %v494_v44  ;;  %v1013_v54 = vpop.f32.mrb[5].mxu0 }
 0x140   :  { %v699_v60 = vpop.f32.mrb[4].mxu1 }
 0x141   :  { %v700_v63 = vadd.f32 %v699_v60, %v613_v51  ;;  %v1048_v6 = vpop.f32.mrb[5].mxu1 }
 0x143   :  { %v717_v14 = vadd.f32 %v716_v59, %v700_v63 }
 0x145   :  { %v726_v21 = vmul.f32 %v725_v12, %v717_v14  ;;  %719 = vrot.lane.b32.xlu0 %v717_v14, %s1203_s30 }
 0x147   :  { %727 = vst [vmem:[%s1575_s5] sm:$0xff] %v726_v21 }
 0x1b7   :  { %v720_v30 = vpop.permute.xlu0 %719 }
 0x1b8   :  { %723 = vst.msk [vmem:[#allocation2] sm:$0xff] %vm25_vm1, %v720_v30 }

</bundles_post_ra>
